<compile_context>
chip_gen: v7x
topology: tpu7x:2x2x1
jax: 0.10.0
libtpu: 0.0.40
codegen_flags: <defaults>
</compile_context>

<pallas_src>
import functools

import jax
import jax.numpy as jnp
from jax.experimental import pallas as pl
from jax.experimental.pallas import tpu as pltpu


def _round_up(a, b):
    return ((a + b - 1) // b) * b


def _vmem_capacity_bytes():
    """Per-TensorCore VMEM capacity (v5e/v6e: 128 MiB, v7x: 64 MiB)."""
    try:
        return int(pltpu.get_tpu_info().vmem_capacity_bytes)
    except Exception:
        return 64 << 20  # conservative fallback: v7x per-TC capacity


@functools.lru_cache(maxsize=None)
def _single_buffer_weights_supported():
    """One-time capability probe for pl.Buffered(1), outside the hot path."""
    if not hasattr(pl, "Buffered"):
        return False
    try:
        def _probe(w_ref, o_ref):
            o_ref[...] = w_ref[...] * 2.0

        spec = pl.BlockSpec((8, 128), lambda i: (0, 0),
                            pipeline_mode=pl.Buffered(1))
        fn = pl.pallas_call(
            _probe,
            out_shape=jax.ShapeDtypeStruct((8, 128), jnp.float32),
            grid=(1,),
            in_specs=[spec],
            out_specs=pl.BlockSpec((8, 128), lambda i: (0, 0)),
        )
        jax.block_until_ready(fn(jnp.zeros((8, 128), jnp.float32)))
        return True
    except Exception:
        return False


def _gating_kernel(x_ref, y_ref, wyx_ref, ug_ref, b_ref, out_ref):
    d = out_ref.shape[-1]
    mm_dtype = wyx_ref.dtype           # MXU operand dtype (bf16 default, or f32)

    x_f32 = x_ref[...].astype(jnp.float32)

    # [y|x] : [tm, 2d] -> one fused K=2d GEMM against [[Wr|Wz|Wg],[Ur|Uz|0]].
    yx = jnp.concatenate(
        [y_ref[...].astype(mm_dtype), x_ref[...].astype(mm_dtype)], axis=1)

    # acc = [Wr(y)+Ur(x) | Wz(y)+Uz(x) | Wg(y)]  (+ folded biases, incl. -bg).
    acc = (jnp.dot(yx, wyx_ref[...], preferred_element_type=jnp.float32)
           + b_ref[...])

    # r = sigmoid(Wr(y) + Ur(x)) ; z = sigmoid(Wz(y) + Uz(x) - bg)
    r = jax.nn.sigmoid(acc[:, 0:d])
    z = jax.nn.sigmoid(acc[:, d:2 * d])

    # h = tanh(Wg(y) + Ug(r * x))        (Ug bias already folded into acc)
    rx = (r * x_f32).astype(mm_dtype)
    h = jnp.tanh(acc[:, 2 * d:3 * d]
                 + jnp.dot(rx, ug_ref[...], preferred_element_type=jnp.float32))

    # g = (1 - z) * x + z * h
    g = (1.0 - z) * x_f32 + z * h
    out_ref[...] = g.astype(out_ref.dtype)


def prepare_params(params, matmul_dtype=jnp.bfloat16):
    """One-time weight prep (hoisted out of the per-call path).

    Transposes PyTorch [out,in] -> [in,out], stacks into a single K=2d GEMM
    operand [[Wr|Wz|Wg],[Ur|Uz|0]] of shape [2d,3d], and folds all biases
    (including -bg) into one packed [1, 3d] row.
    """
    d = params["Wr_w"].shape[0]
    if d % 128 != 0:
        raise ValueError("d_model must be a multiple of 128 (lane alignment)")
    top = jnp.concatenate(
        [params["Wr_w"].T, params["Wz_w"].T, params["Wg_w"].T], axis=1)      # [d,3d]
    bot = jnp.concatenate(
        [params["Ur_w"].T, params["Uz_w"].T,
         jnp.zeros((d, d), params["Ur_w"].dtype)], axis=1)                   # [d,3d]
    wyx = jnp.concatenate([top, bot], axis=0).astype(matmul_dtype)           # [2d,3d]
    ug = params["Ug_w"].T.astype(matmul_dtype)                               # [d,d]
    bias = jnp.concatenate(
        [
            params["Wr_b"] + params["Ur_b"],
            params["Wz_b"] + params["Uz_b"] - params["bg"],
            params["Wg_b"] + params["Ug_b"],
        ]
    ).reshape(1, 3 * d).astype(jnp.float32)                                  # [1,3d]
    return {"wyx": wyx, "ug": ug, "bias": bias}


def gating_mechanism(x, y, prepped, *, tm=1024):
    """x, y: [..., d_model] float32.  prepped: output of prepare_params()."""
    orig_shape = x.shape
    d = orig_shape[-1]
    if d % 128 != 0:
        raise ValueError("d_model must be a multiple of 128 (lane alignment)")

    x2 = x.reshape(-1, d)
    y2 = y.reshape(-1, d)
    n = x2.shape[0]

    wyx, ug, bias = prepped["wyx"], prepped["ug"], prepped["bias"]
    w_item = jnp.dtype(wyx.dtype).itemsize
    a_item = jnp.dtype(x2.dtype).itemsize

    single_buf = _single_buffer_weights_supported()
    weight_mult = 1 if single_buf else 2       # double-buffered weights if no Buffered(1)
    weight_bytes = (wyx.size + ug.size + bias.size) * w_item * weight_mult

    cap = _vmem_capacity_bytes() - (8 << 20)   # per-core capacity with headroom

    def footprint(t):
        rows = 3 * t * d * a_item * 2                       # x, y, out (double-buffered)
        inter = t * 3 * d * 4 + t * 2 * d * w_item + 4 * t * d * 4   # acc, [y|x], temporaries
        return weight_bytes + rows + inter

    # Row tile: multiple of 8 sublanes, or the full row count (ragged tail is
    # masked in-kernel by Pallas; no wrapper-side padding or output slicing).
    tm_eff = min(_round_up(tm, 8), n)
    while footprint(tm_eff) > cap and tm_eff > 8:
        tm_eff = max(8, _round_up(tm_eff // 2, 8))
    if footprint(tm_eff) > cap:
        # TODO(synk): add a K-reduction grid axis (stream weight K-tiles from
        # HBM into an f32 VMEM accumulator) for d_model too large for full
        # weight residency (e.g. f32 weights at d >~ 1400 on v7x's 64 MiB VMEM).
        raise ValueError("resident weights + minimum tiles exceed per-core VMEM; "
                         "use bf16 weights or a smaller d_model")

    vmem_limit = int(min(max(footprint(tm_eff) + (4 << 20), 32 << 20), cap))

    def weight_spec(shape):
        # Constant index map -> block resident across the whole grid;
        # Buffered(1) avoids paying 2x VMEM for double buffering.
        if single_buf:
            return pl.BlockSpec(shape, lambda i: (0, 0),
                                pipeline_mode=pl.Buffered(1))
        return pl.BlockSpec(shape, lambda i: (0, 0))

    row_spec = pl.BlockSpec((tm_eff, d), lambda i: (i, 0))
    grid_spec = pltpu.PrefetchScalarGridSpec(
        num_scalar_prefetch=0,
        grid=(pl.cdiv(n, tm_eff),),
        in_specs=[
            row_spec, row_spec,                  # x, y
            weight_spec((2 * d, 3 * d)),         # [[Wr|Wz|Wg],[Ur|Uz|0]]
            weight_spec((d, d)),                 # Ug^T
            weight_spec((1, 3 * d)),             # folded biases
        ],
        out_specs=row_spec,
    )

    out = pl.pallas_call(
        _gating_kernel,
        out_shape=jax.ShapeDtypeStruct((n, d), x.dtype),
        grid_spec=grid_spec,
        compiler_params=pltpu.CompilerParams(
            dimension_semantics=("parallel",),
            vmem_limit_bytes=vmem_limit,
        ),
    )(x2, y2, wyx, ug, bias)

    return out.reshape(orig_shape)


def init_params(key, d_model, bg_init=2.0):
    """Deterministic synthetic init matching the PyTorch module's shapes."""
    names = ["Wr", "Ur", "Wz", "Uz", "Wg", "Ug"]
    keys = jax.random.split(key, 2 * len(names))
    params = {}
    bound = 1.0 / float(d_model) ** 0.5
    for i, name in enumerate(names):
        params[f"{name}_w"] = jax.random.uniform(
            keys[2 * i], (d_model, d_model), jnp.float32, -bound, bound
        )
        params[f"{name}_b"] = jax.random.uniform(
            keys[2 * i + 1], (d_model,), jnp.float32, -bound, bound
        )
    params["bg"] = jnp.full((d_model,), bg_init, dtype=jnp.float32)
    return params


def gating_reference(x, y, p):
    """Pure-JAX reference of the PyTorch forward (full-precision matmuls)."""
    hp = jax.lax.Precision.HIGHEST

    def lin(inp, w, b):
        return jnp.dot(inp, w.T, precision=hp) + b

    r = jax.nn.sigmoid(lin(y, p["Wr_w"], p["Wr_b"]) + lin(x, p["Ur_w"], p["Ur_b"]))
    z = jax.nn.sigmoid(
        lin(y, p["Wz_w"], p["Wz_b"]) + lin(x, p["Uz_w"], p["Uz_b"]) - p["bg"]
    )
    h = jnp.tanh(lin(y, p["Wg_w"], p["Wg_b"]) + lin(r * x, p["Ug_w"], p["Ug_b"]))
    return (1.0 - z) * x + z * h


if __name__ == "__main__":
    key = jax.random.PRNGKey(0)
    d_model = 128            # multiple of 128: lane-dense blocks, unmasked stores
    batch, seq = 2, 8

    k_p, k_x, k_y = jax.random.split(key, 3)
    params = init_params(k_p, d_model)

    x = jax.random.normal(k_x, (batch, seq, d_model), jnp.float32)
    y = jax.random.normal(k_y, (batch, seq, d_model), jnp.float32)

    ref = gating_reference(x, y, params)

    # f32 MXU operands (validation path): tight check against the reference.
    prepped_f32 = prepare_params(params, matmul_dtype=jnp.float32)
    out_f32 = jax.block_until_ready(gating_mechanism(x, y, prepped_f32))
    assert out_f32.shape == ref.shape
    assert jnp.allclose(out_f32, ref, atol=2e-3, rtol=2e-3), "f32 kernel mismatch"

    # bf16 MXU operands (default fast path), f32 accumulation + f32 gate math.
    prepped_bf16 = prepare_params(params)            # bf16 default
    out_bf16 = jax.block_until_ready(gating_mechanism(x, y, prepped_bf16))
    assert jnp.allclose(out_bf16, ref, atol=5e-2, rtol=5e-2), "bf16 kernel mismatch"

    # Ragged-N path: no wrapper pad/slice; the last row-block is masked in-kernel.
    n_ragged = 13
    xr = x.reshape(-1, d_model)[:n_ragged]
    yr = y.reshape(-1, d_model)[:n_ragged]
    out_r = jax.block_until_ready(gating_mechanism(xr, yr, prepped_f32, tm=8))
    ref_r = ref.reshape(-1, d_model)[:n_ragged]
    assert jnp.allclose(out_r, ref_r, atol=2e-3, rtol=2e-3), "ragged-N mismatch"

    print("KERNEL_OK")
</pallas_src>

<mosaic_0001>
module attributes {stable_mosaic.version = 11 : i64} {
  func.func @_probe(%arg0: i32, %arg1: memref<8x128xf32, #tpu.memory_space<vmem>>, %arg2: memref<8x128xf32, #tpu.memory_space<vmem>>) attributes {dimension_semantics = [#tpu.dimension_semantics<arbitrary>], iteration_bounds = array<i64: 1>, scalar_prefetch = 0 : i64, scratch_operands = 0 : i64, tpu.core_type = #tpu.core_type<tc>, window_params = [{pipeline_mode = #tpu.pipeline_mode<synchronous>, transform_indices = @transform_0, window_bounds = array<i64: 8, 128>}, {pipeline_mode = #tpu.pipeline_mode<synchronous>, transform_indices = @transform_1, window_bounds = array<i64: 8, 128>}]} {
    %c0 = arith.constant 0 : index
    %c0_0 = arith.constant 0 : index
    %0 = vector.load %arg1[%c0, %c0_0] : memref<8x128xf32, #tpu.memory_space<vmem>>, vector<8x128xf32>
    %cst = arith.constant 2.000000e+00 : f32
    %1 = vector.broadcast %cst : f32 to vector<8x128xf32>
    %2 = arith.mulf %0, %1 : vector<8x128xf32>
    %c0_1 = arith.constant 0 : index
    %c0_2 = arith.constant 0 : index
    %3 = vector.load %arg2[%c0_1, %c0_2] : memref<8x128xf32, #tpu.memory_space<vmem>>, vector<8x128xf32>
    tpu.vector_store %arg2[%c0_1, %c0_2], %2 {strides = array<i32>} : memref<8x128xf32, #tpu.memory_space<vmem>>, vector<8x128xf32>,
    return
  }
  func.func @transform_0(%arg0: i32) -> (i32, i32) {
    %c0_i32 = arith.constant 0 : i32
    %c0_i32_0 = arith.constant 0 : i32
    %c0_i32_1 = arith.constant 0 : i32
    return %c0_i32, %c0_i32_0 : i32, i32
  }
  func.func @transform_1(%arg0: i32) -> (i32, i32) {
    %c0_i32 = arith.constant 0 : i32
    %c0_i32_0 = arith.constant 0 : i32
    %c0_i32_1 = arith.constant 0 : i32
    return %c0_i32, %c0_i32_0 : i32, i32
  }
}

module attributes {stable_mosaic.version = 11 : i64} {
  func.func @_gating_kernel(%arg0: i32, %arg1: memref<16x128xf32, #tpu.memory_space<vmem>>, %arg2: memref<16x128xf32, #tpu.memory_space<vmem>>, %arg3: memref<256x384xf32, #tpu.memory_space<vmem>>, %arg4: memref<128x128xf32, #tpu.memory_space<vmem>>, %arg5: memref<1x384xf32, #tpu.memory_space<vmem>>, %arg6: memref<16x128xf32, #tpu.memory_space<vmem>>) attributes {dimension_semantics = [#tpu.dimension_semantics<parallel>], iteration_bounds = array<i64: 1>, scalar_prefetch = 0 : i64, scratch_operands = 0 : i64, tpu.core_type = #tpu.core_type<tc>, window_params = [{transform_indices = @transform_0, window_bounds = array<i64: 16, 128>}, {transform_indices = @transform_1, window_bounds = array<i64: 16, 128>}, {pipeline_mode = #tpu.pipeline_mode<synchronous>, transform_indices = @transform_2, window_bounds = array<i64: 256, 384>}, {pipeline_mode = #tpu.pipeline_mode<synchronous>, transform_indices = @transform_3, window_bounds = array<i64: 128, 128>}, {pipeline_mode = #tpu.pipeline_mode<synchronous>, transform_indices = @transform_4, window_bounds = array<i64: 1, 384>}, {transform_indices = @transform_5, window_bounds = array<i64: 16, 128>}]} {
    %c0 = arith.constant 0 : index
    %c0_0 = arith.constant 0 : index
    %0 = vector.load %arg1[%c0, %c0_0] : memref<16x128xf32, #tpu.memory_space<vmem>>, vector<16x128xf32>
    %c0_1 = arith.constant 0 : index
    %c0_2 = arith.constant 0 : index
    %1 = vector.load %arg2[%c0_1, %c0_2] : memref<16x128xf32, #tpu.memory_space<vmem>>, vector<16x128xf32>
    %c0_3 = arith.constant 0 : index
    %c0_4 = arith.constant 0 : index
    %2 = vector.load %arg1[%c0_3, %c0_4] : memref<16x128xf32, #tpu.memory_space<vmem>>, vector<16x128xf32>
    %3 = tpu.concatenate %1, %2 in 1 : vector<16x128xf32>, vector<16x128xf32> -> vector<16x256xf32>
    %c0_5 = arith.constant 0 : index
    %c0_6 = arith.constant 0 : index
    %4 = vector.load %arg3[%c0_5, %c0_6] : memref<256x384xf32, #tpu.memory_space<vmem>>, vector<256x384xf32>
    %cst = arith.constant dense<0.000000e+00> : vector<16x384xf32>
    %5 = tpu.matmul %3, %4, %cst {dimension_numbers = #tpu.dot_dimension_numbers<[1], [0], [0], [1], [0, 0, 1, 1], [], []>} : vector<16x256xf32>, vector<256x384xf32>, vector<16x384xf32> -> vector<16x384xf32>
    %c0_7 = arith.constant 0 : index
    %c0_8 = arith.constant 0 : index
    %6 = vector.load %arg5[%c0_7, %c0_8] : memref<1x384xf32, #tpu.memory_space<vmem>>, vector<1x384xf32>
    %7 = vector.broadcast %6 : vector<1x384xf32> to vector<16x384xf32>
    %8 = arith.addf %5, %7 : vector<16x384xf32>
    %9 = vector.extract_strided_slice %8 {offsets = [0, 0], sizes = [16, 128], strides = [1, 1]} : vector<16x384xf32> to vector<16x128xf32>
    %10 = arith.negf %9 : vector<16x128xf32>
    %11 = math.exp %10 : vector<16x128xf32>
    %cst_9 = arith.constant 1.000000e+00 : f32
    %12 = vector.broadcast %cst_9 : f32 to vector<16x128xf32>
    %13 = arith.addf %12, %11 : vector<16x128xf32>
    %14 = arith.divf %12, %13 : vector<16x128xf32>
    %15 = vector.extract_strided_slice %8 {offsets = [0, 128], sizes = [16, 128], strides = [1, 1]} : vector<16x384xf32> to vector<16x128xf32>
    %16 = arith.negf %15 : vector<16x128xf32>
    %17 = math.exp %16 : vector<16x128xf32>
    %cst_10 = arith.constant 1.000000e+00 : f32
    %18 = vector.broadcast %cst_10 : f32 to vector<16x128xf32>
    %19 = arith.addf %18, %17 : vector<16x128xf32>
    %20 = arith.divf %18, %19 : vector<16x128xf32>
    %21 = arith.mulf %14, %0 : vector<16x128xf32>
    %22 = vector.extract_strided_slice %8 {offsets = [0, 256], sizes = [16, 128], strides = [1, 1]} : vector<16x384xf32> to vector<16x128xf32>
    %c0_11 = arith.constant 0 : index
    %c0_12 = arith.constant 0 : index
    %23 = vector.load %arg4[%c0_11, %c0_12] : memref<128x128xf32, #tpu.memory_space<vmem>>, vector<128x128xf32>
    %cst_13 = arith.constant dense<0.000000e+00> : vector<16x128xf32>
    %24 = tpu.matmul %21, %23, %cst_13 {dimension_numbers = #tpu.dot_dimension_numbers<[1], [0], [0], [1], [0, 0, 1, 1], [], []>} : vector<16x128xf32>, vector<128x128xf32>, vector<16x128xf32> -> vector<16x128xf32>
    %25 = arith.addf %22, %24 : vector<16x128xf32>
    %26 = math.tanh %25 : vector<16x128xf32>
    %cst_14 = arith.constant 1.000000e+00 : f32
    %27 = vector.broadcast %cst_14 : f32 to vector<16x128xf32>
    %28 = arith.subf %27, %20 : vector<16x128xf32>
    %29 = arith.mulf %28, %0 : vector<16x128xf32>
    %30 = arith.mulf %20, %26 : vector<16x128xf32>
    %31 = arith.addf %29, %30 : vector<16x128xf32>
    %c0_15 = arith.constant 0 : index
    %c0_16 = arith.constant 0 : index
    %32 = vector.load %arg6[%c0_15, %c0_16] : memref<16x128xf32, #tpu.memory_space<vmem>>, vector<16x128xf32>
    tpu.vector_store %arg6[%c0_15, %c0_16], %31 {strides = array<i32>} : memref<16x128xf32, #tpu.memory_space<vmem>>, vector<16x128xf32>,
    return
  }
  func.func @transform_0(%arg0: i32) -> (i32, i32) {
    %c0_i32 = arith.constant 0 : i32
    %c0_i32_0 = arith.constant 0 : i32
    return %arg0, %c0_i32 : i32, i32
  }
  func.func @transform_1(%arg0: i32) -> (i32, i32) {
    %c0_i32 = arith.constant 0 : i32
    %c0_i32_0 = arith.constant 0 : i32
    return %arg0, %c0_i32 : i32, i32
  }
  func.func @transform_2(%arg0: i32) -> (i32, i32) {
    %c0_i32 = arith.constant 0 : i32
    %c0_i32_0 = arith.constant 0 : i32
    %c0_i32_1 = arith.constant 0 : i32
    return %c0_i32, %c0_i32_0 : i32, i32
  }
  func.func @transform_3(%arg0: i32) -> (i32, i32) {
    %c0_i32 = arith.constant 0 : i32
    %c0_i32_0 = arith.constant 0 : i32
    %c0_i32_1 = arith.constant 0 : i32
    return %c0_i32, %c0_i32_0 : i32, i32
  }
  func.func @transform_4(%arg0: i32) -> (i32, i32) {
    %c0_i32 = arith.constant 0 : i32
    %c0_i32_0 = arith.constant 0 : i32
    %c0_i32_1 = arith.constant 0 : i32
    return %c0_i32, %c0_i32_0 : i32, i32
  }
  func.func @transform_5(%arg0: i32) -> (i32, i32) {
    %c0_i32 = arith.constant 0 : i32
    %c0_i32_0 = arith.constant 0 : i32
    return %arg0, %c0_i32 : i32, i32
  }
}

</mosaic_0001>

<bundles_post_ra>
// kernel: tpu_custom_call.1
= control target key start
LH: loop header
LB: loop body
LE: loop exit
PB: predicated region body
PF: predicated region fallthrough
CT: control target
= control target key end

     0   :  { %6 = vsyncpa [#allocation3], 0  ;;  %s125_s0 = inlined_call_operand.hbm [shape: f32[8,128], index: 0, kind: input, shape index: {}]   ;;  %s126_s1 = inlined_call_operand.hbm [shape: f32[8,128], index: 1, kind: output, shape index: {}]  }
   0x1   :  { %7 = vsyncpa [#allocation4], 0  ;;  %s89_s6 = smov [#allocation2]   ;;  %s41_s10 = scalar_lea.hbm %s125_s0, 128 }
   0x2   :  { %s14_s7 = sshll.u32 %s89_s6, 4  ;;  %p42_p0 = scmp.ne.s32.totalorder %s125_s0, %s41_s10  ;;  %s15_s7 = int_to_ptr.vmem [resolvable:$true] %s14_s7 }
   0x3   :  { %p45_p1 = scmp.lt.u32.totalorder %s41_s10, %s125_s0 }
   0x5   :  { %p47_p2 = pnand %p45_p1, %p42_p0 }
   0x7   :  { %50 = shalt.err (!%p47_p2)
}
   0x8   :  { %s51_s15 = scalar_lea.vmem %s15_s7, 128  ;;  %p56_p4 = scmp.lt.s32.totalorder %s15_s7, %s15_s7 }
   0x9   :  { %p52_p3 = scmp.ne.s32.totalorder %s15_s7, %s51_s15  ;;  %p57_p5 = scmp.lt.s32.totalorder %s51_s15, %s51_s15 }
   0xb   :  { %p58_p6 = por %p57_p5, %p56_p4 }
   0xd   :  { %p59_p7 = pnand %p58_p6, %p52_p3 }
   0xf   :  { %62 = shalt.err (!%p59_p7)
}
  0x10   :  { %17 = dma.hbm_to_vmem [thread:$0]  %s125_s0, 128, %s15_s7, [#allocation3]  }
  0x11   :  { %85 = dma.done.wait [#allocation3], 128  }
  0x12   :  { %86 = vsyncadd [#allocation3], 4294967168  ;;  %s90_s18 = smov [#allocation5]   ;;  %v21_v0 = vld [vmem:[#allocation2] sm:$0xff] }
  0x13   :  { %s30_s19 = sshll.u32 %s90_s18, 4  ;;  %v22_v1 = vmul.f32 2.0, %v21_v0  ;;  %s31_s19 = int_to_ptr.vmem [resolvable:$true] %s30_s19 }
  0x14   :  { %s63_s20 = scalar_lea.vmem %s31_s19, 128  ;;  %p68_p9 = scmp.lt.s32.totalorder %s31_s19, %s31_s19 }
  0x15   :  { %23 = vst [vmem:[#allocation5] sm:$0xff] %v22_v1  ;;  %p64_p8 = scmp.ne.s32.totalorder %s31_s19, %s63_s20  ;;  %p69_p10 = scmp.lt.s32.totalorder %s63_s20, %s63_s20 }
  0x17   :  { %p70_p11 = por %p69_p10, %p68_p9 }
  0x19   :  { %p71_p12 = pnand %p70_p11, %p64_p8 }
  0x1b   :  { %74 = shalt.err (!%p71_p12)
}
  0x1c   :  { %s75_s23 = scalar_lea.hbm %s126_s1, 128 }
  0x1d   :  { %p76_p13 = scmp.ne.s32.totalorder %s126_s1, %s75_s23  ;;  %p79_p0 = scmp.lt.u32.totalorder %s75_s23, %s126_s1 }
  0x1f   :  { %p81_p1 = pnand %p79_p0, %p76_p13 }
  0x21   :  { %84 = shalt.err (!%p81_p1)
}
  0x22   :  { %33 = dma.vmem_to_hbm [thread:$0]  %s31_s19, 128, %s126_s1, [#allocation4]  }
  0x23   :  { %87 = dma.done.wait [#allocation4], 128  }
  0x24   :  { %88 = vsyncadd [#allocation4], 4294967168 }
  0x25   :  { %37 = vsyncpa [#allocation3], 1 }
  0x26   :  { %38 = vsyncpa [#allocation4], 1 }

// kernel: tpu_custom_call.1
= control target key start
LH: loop header
LB: loop body
LE: loop exit
PB: predicated region body
PF: predicated region fallthrough
CT: control target
= control target key end

     0   :  { %10 = vsyncpa [#allocation3], 0  ;;  %s998_s0 = inlined_call_operand.hbm [shape: f32[16,128], index: 0, kind: input, shape index: {}]   ;;  %s999_s1 = inlined_call_operand.hbm [shape: f32[16,128], index: 1, kind: input, shape index: {}]   ;;  %s1000_s2 = inlined_call_operand.hbm [shape: f32[256,384], index: 2, kind: input, shape index: {}]   ;;  %s1001_s3 = inlined_call_operand.hbm [shape: f32[128,128], index: 3, kind: input, shape index: {}]   ;;  %s1002_s4 = inlined_call_operand.vmem [shape: f32[1,384], index: 4, kind: input, shape index: {}]   ;;  %s1003_s5 = inlined_call_operand.hbm [shape: f32[16,128], index: 5, kind: output, shape index: {}]  }
   0x1   :  { %11 = vsyncpa [#allocation6], 0 }
   0x2   :  { %12 = vsyncpa [#allocation9], 0 }
   0x3   :  { %13 = vsyncpa [#allocation4], 0  ;;  %s865_s18 = smov [#allocation5]   ;;  %s866_s20 = smov [#allocation2]  }
   0x4   :  { %s31_s19 = sshll.u32 %s865_s18, 4  ;;  %s19_s21 = sshll.u32 %s866_s20, 4  ;;  %s32_s19 = int_to_ptr.vmem [resolvable:$true] %s31_s19  ;;  %s904_s21 = int_to_ptr.vmem [resolvable:$true] %s19_s21 }
   0x5   :  { %s747_s24 = scalar_lea.hbm %s999_s1, 256 }
   0x6   :  { %p748_p0 = scmp.ne.s32.totalorder %s999_s1, %s747_s24  ;;  %p751_p1 = scmp.lt.u32.totalorder %s747_s24, %s999_s1 }
   0x8   :  { %p753_p2 = pnand %p751_p1, %p748_p0 }
   0xa   :  { %756 = shalt.err (!%p753_p2)
}
   0xb   :  { %s757_s29 = scalar_lea.vmem %s32_s19, 256  ;;  %p762_p4 = scmp.lt.s32.totalorder %s32_s19, %s32_s19 }
   0xc   :  { %p758_p3 = scmp.ne.s32.totalorder %s32_s19, %s757_s29  ;;  %p763_p5 = scmp.lt.s32.totalorder %s757_s29, %s757_s29 }
   0xe   :  { %p764_p6 = por %p763_p5, %p762_p4 }
  0x10   :  { %p765_p7 = pnand %p764_p6, %p758_p3 }
  0x12   :  { %768 = shalt.err (!%p765_p7)
}
  0x13   :  { %s867_s30 = smov 128   ;;  %s868_s6 = smov 8  }
  0x14   :  { %37 = dma.hbm_to_vmem [thread:$0]  %s999_s1, 256, %s32_s19, [#allocation6], %s867_s30, %s867_s30, %s868_s6  }
  0x15   :  { %s769_s11 = scalar_lea.hbm %s998_s0, 256 }
  0x16   :  { %p770_p8 = scmp.ne.s32.totalorder %s998_s0, %s769_s11  ;;  %p773_p9 = scmp.lt.u32.totalorder %s769_s11, %s998_s0 }
  0x18   :  { %p775_p10 = pnand %p773_p9, %p770_p8 }
  0x1a   :  { %778 = shalt.err (!%p775_p10)
}
  0x1b   :  { %s779_s16 = scalar_lea.vmem %s904_s21, 256  ;;  %p784_p12 = scmp.lt.s32.totalorder %s904_s21, %s904_s21 }
  0x1c   :  { %p780_p11 = scmp.ne.s32.totalorder %s904_s21, %s779_s16  ;;  %p785_p13 = scmp.lt.s32.totalorder %s779_s16, %s779_s16 }
  0x1e   :  { %p786_p0 = por %p785_p13, %p784_p12 }
  0x20   :  { %p787_p1 = pnand %p786_p0, %p780_p11 }
  0x22   :  { %790 = shalt.err (!%p787_p1)
}
  0x23   :  { %25 = dma.hbm_to_vmem [thread:$0]  %s998_s0, 256, %s904_s21, [#allocation3], %s867_s30, %s867_s30, %s868_s6  }
  0x24   :  { %s869_s18 = smov [#allocation7]   ;;  %s791_s23 = scalar_lea.hbm %s1000_s2, 12288 }
  0x25   :  { %s43_s19 = sshll.u32 %s869_s18, 4  ;;  %p792_p2 = scmp.ne.s32.totalorder %s1000_s2, %s791_s23  ;;  %s44_s19 = int_to_ptr.vmem [resolvable:$true] %s43_s19 }
  0x26   :  { %p795_p3 = scmp.lt.u32.totalorder %s791_s23, %s1000_s2 }
  0x28   :  { %p797_p4 = pnand %p795_p3, %p792_p2 }
  0x2a   :  { %800 = shalt.err (!%p797_p4)
}
  0x2b   :  { %s801_s28 = scalar_lea.vmem %s44_s19, 12288  ;;  %p806_p6 = scmp.lt.s32.totalorder %s44_s19, %s44_s19 }
  0x2c   :  { %p802_p5 = scmp.ne.s32.totalorder %s44_s19, %s801_s28  ;;  %p807_p7 = scmp.lt.s32.totalorder %s801_s28, %s801_s28 }
  0x2e   :  { %p808_p8 = por %p807_p7, %p806_p6 }
  0x30   :  { %p809_p9 = pnand %p808_p8, %p802_p5 }
  0x32   :  { %812 = shalt.err (!%p809_p9)
}
  0x33   :  { %s870_s0 = smov 384   ;;  %s871_s21 = smov 24  }
  0x34   :  { %49 = dma.hbm_to_vmem [thread:$0]  %s1000_s2, 12288, %s44_s19, [#allocation6], %s870_s0, %s870_s0, %s871_s21  }
  0x35   :  { %s872_s8 = smov [#allocation8]   ;;  %s813_s12 = scalar_lea.hbm %s1001_s3, 2048 }
  0x36   :  { %s55_s9 = sshll.u32 %s872_s8, 4  ;;  %p814_p10 = scmp.ne.s32.totalorder %s1001_s3, %s813_s12  ;;  %s56_s9 = int_to_ptr.vmem [resolvable:$true] %s55_s9 }
  0x37   :  { %p817_p11 = scmp.lt.u32.totalorder %s813_s12, %s1001_s3 }
  0x39   :  { %p819_p12 = pnand %p817_p11, %p814_p10 }
  0x3b   :  { %822 = shalt.err (!%p819_p12)
}
  0x3c   :  { %s823_s1 = scalar_lea.vmem %s56_s9, 2048  ;;  %p828_p0 = scmp.lt.s32.totalorder %s56_s9, %s56_s9 }
  0x3d   :  { %p824_p13 = scmp.ne.s32.totalorder %s56_s9, %s823_s1  ;;  %p829_p1 = scmp.lt.s32.totalorder %s823_s1, %s823_s1 }
  0x3f   :  { %p830_p2 = por %p829_p1, %p828_p0 }
  0x41   :  { %p831_p3 = pnand %p830_p2, %p824_p13 }
  0x43   :  { %834 = shalt.err (!%p831_p3)
}
  0x44   :  { %61 = dma.hbm_to_vmem [thread:$0]  %s1001_s3, 2048, %s56_s9, [#allocation9], %s867_s30, %s867_s30, %s868_s6  }
  0x45   :  { %857 = dma.done.wait [#allocation3], 256  }
  0x46   :  { %858 = vsyncadd [#allocation3], 4294967040 }
  0x47   :  { %859 = dma.done.wait [#allocation6], 12544  }
  0x48   :  { %860 = vsyncadd [#allocation6], 4294954752 }
  0x49   :  { %861 = dma.done.wait [#allocation9], 2048  }
  0x4a   :  { %862 = vsyncadd [#allocation9], 4294965248  ;;  %v81_v0 = vld [vmem:[#allocation7 + $0x8] sm:$0xff]  ;;  %v84_v1 = vld [vmem:[#allocation7 + $0x20] sm:$0xff] }
  0x4b   :  { %v80_v2 = vld [vmem:[#allocation7] sm:$0xff]  ;;  %v590_v3 = vpack.c.bf16 %v84_v1, %v81_v0  ;;  %v83_v4 = vld [vmem:[#allocation7 + $0x18] sm:$0xff]  ;;  %v90_v6 = vld [vmem:[#allocation7 + $0x50] sm:$0xff] }
  0x4c   :  { %v87_v5 = vld [vmem:[#allocation7 + $0x38] sm:$0xff]  ;;  %v592_v7 = vpack.c.bf16 %v83_v4, %v80_v2  ;;  %v86_v9 = vld [vmem:[#allocation7 + $0x30] sm:$0xff]  ;;  %v89_v10 = vld [vmem:[#allocation7 + $0x48] sm:$0xff] }
  0x4d   :  { %v594_v8 = vpack.c.bf16 %v90_v6, %v87_v5  ;;  %v93_v11 = vld [vmem:[#allocation7 + $0x68] sm:$0xff]  ;;  %591 = vmatprep.subr.bf16.mxu0 %v590_v3  ;;  %v96_v12 = vld [vmem:[#allocation7 + $0x80] sm:$0xff]  ;;  %v596_v13 = vpack.c.bf16 %v89_v10, %v86_v9  ;;  %v95_v16 = vld [vmem:[#allocation7 + $0x78] sm:$0xff] }
  0x4e   :  { %593 = vmatpush1.bf16.msra.mxu0 %v592_v7  ;;  %v598_v14 = vpack.c.bf16 %v96_v12, %v93_v11  ;;  %v92_v15 = vld [vmem:[#allocation7 + $0x60] sm:$0xff]  ;;  %v99_v17 = vld [vmem:[#allocation7 + $0x98] sm:$0xff]  ;;  %v102_v18 = vld [vmem:[#allocation7 + $0xb0] sm:$0xff] }
  0x4f   :  { %595 = vmatprep.subr.bf16.mxu0 %v594_v8  ;;  %v600_v19 = vpack.c.bf16 %v95_v16, %v92_v15  ;;  %v602_v20 = vpack.c.bf16 %v102_v18, %v99_v17  ;;  %v98_v21 = vld [vmem:[#allocation7 + $0x90] sm:$0xff]  ;;  %v101_v22 = vld [vmem:[#allocation7 + $0xa8] sm:$0xff]  ;;  %v108_v24 = vld [vmem:[#allocation7 + $0xe0] sm:$0xff] }
  0x50   :  { %v105_v23 = vld [vmem:[#allocation7 + $0xc8] sm:$0xff]  ;;  %v604_v25 = vpack.c.bf16 %v101_v22, %v98_v21  ;;  %v104_v27 = vld [vmem:[#allocation7 + $0xc0] sm:$0xff]  ;;  %v107_v28 = vld [vmem:[#allocation7 + $0xd8] sm:$0xff] }
  0x51   :  { %v606_v26 = vpack.c.bf16 %v108_v24, %v105_v23  ;;  %v111_v29 = vld [vmem:[#allocation7 + $0xf8] sm:$0xff]  ;;  %v114_v30 = vld [vmem:[#allocation7 + $0x110] sm:$0xff]  ;;  %v608_v31 = vpack.c.bf16 %v107_v28, %v104_v27  ;;  %v113_v34 = vld [vmem:[#allocation7 + $0x108] sm:$0xff] }
  0x52   :  { %597 = vmatpush1.bf16.msra.mxu0 %v596_v13  ;;  %v610_v32 = vpack.c.bf16 %v114_v30, %v111_v29  ;;  %v110_v33 = vld [vmem:[#allocation7 + $0xf0] sm:$0xff]  ;;  %v117_v35 = vld [vmem:[#allocation7 + $0x128] sm:$0xff]  ;;  %v120_v36 = vld [vmem:[#allocation7 + $0x140] sm:$0xff] }
  0x53   :  { %599 = vmatprep.subr.bf16.mxu0 %v598_v14  ;;  %v612_v37 = vpack.c.bf16 %v113_v34, %v110_v33  ;;  %v614_v38 = vpack.c.bf16 %v120_v36, %v117_v35  ;;  %v116_v39 = vld [vmem:[#allocation7 + $0x120] sm:$0xff]  ;;  %v119_v40 = vld [vmem:[#allocation7 + $0x138] sm:$0xff]  ;;  %v126_v43 = vld [vmem:[#allocation7 + $0x170] sm:$0xff] }
  0x54   :  { %v968_v41 = vld [vmem:[#allocation2] sm:$0xff]  ;;  %v123_v42 = vld [vmem:[#allocation7 + $0x158] sm:$0xff]  ;;  %v130_v44 = vld [vmem:[#allocation7 + $0x190] sm:$0xff]  ;;  %v616_v50 = vpack.c.bf16 %v119_v40, %v116_v39 }
  0x55   :  { %257 = vmatprep.mubr.f32.mxu0 %v968_v41  ;;  %334 = vmatprep.mubr.f32.mxu1 %v968_v41  ;;  %v122_v45 = vld [vmem:[#allocation7 + $0x150] sm:$0xff]  ;;  %v125_v46 = vld [vmem:[#allocation7 + $0x168] sm:$0xff]  ;;  %v136_v53 = vld [vmem:[#allocation7 + $0x1c0] sm:$0xff]  ;;  %v618_v56 = vpack.c.bf16 %v126_v43, %v123_v42 }
  0x56   :  { %601 = vmatpush1.bf16.msra.mxu0 %v600_v19  ;;  %v133_v47 = vld [vmem:[#allocation7 + $0x1a8] sm:$0xff]  ;;  %v82_v48 = vld [vmem:[#allocation7 + $0x10] sm:$0xff]  ;;  %v139_v54 = vld [vmem:[#allocation7 + $0x1d8] sm:$0xff]  ;;  %v620_v0 = vpack.c.bf16 %v125_v46, %v122_v45 }
  0x57   :  { %603 = vmatprep.subr.bf16.mxu0 %v602_v20  ;;  %v85_v49 = vld [vmem:[#allocation7 + $0x28] sm:$0xff]  ;;  %v654_v51 = vpack.c.bf16 %v133_v47, %v130_v44  ;;  %v88_v55 = vld [vmem:[#allocation7 + $0x40] sm:$0xff]  ;;  %v658_v57 = vpack.c.bf16 %v139_v54, %v136_v53  ;;  %v91_v58 = vld [vmem:[#allocation7 + $0x58] sm:$0xff] }
  0x58   :  { %v656_v52 = vpack.c.bf16 %v85_v49, %v82_v48  ;;  %v142_v59 = vld [vmem:[#allocation7 + $0x1f0] sm:$0xff]  ;;  %v145_v60 = vld [vmem:[#allocation7 + $0x208] sm:$0xff]  ;;  %v132_v62 = vld [vmem:[#allocation7 + $0x1a0] sm:$0xff]  ;;  %v660_v63 = vpack.c.bf16 %v91_v58, %v88_v55 }
  0x59   :  { %v129_v61 = vld [vmem:[#allocation7 + $0x188] sm:$0xff]  ;;  %655 = vmatprep.subr.bf16.mxu1 %v654_v51  ;;  %v128_v1 = vld [vmem:[#allocation7 + $0x180] sm:$0xff]  ;;  %v662_v2 = vpack.c.bf16 %v145_v60, %v142_v59  ;;  %v94_v3 = vld [vmem:[#allocation7 + $0x70] sm:$0xff] }
  0x5a   :  { %605 = vmatpush1.bf16.msra.mxu0 %v604_v25  ;;  %657 = vmatpush3.bf16.msra.mxu1 %v656_v52  ;;  %v97_v4 = vld [vmem:[#allocation7 + $0x88] sm:$0xff]  ;;  %v622_v5 = vpack.c.bf16 %v132_v62, %v129_v61  ;;  %v131_v6 = vld [vmem:[#allocation7 + $0x198] sm:$0xff]  ;;  %v148_v7 = vld [vmem:[#allocation7 + $0x220] sm:$0xff] }
  0x5b   :  { %607 = vmatprep.subr.bf16.mxu0 %v606_v26  ;;  %659 = vmatprep.subr.bf16.mxu1 %v658_v57  ;;  %v151_v8 = vld [vmem:[#allocation7 + $0x238] sm:$0xff]  ;;  %v138_v10 = vld [vmem:[#allocation7 + $0x1d0] sm:$0xff]  ;;  %v664_v11 = vpack.c.bf16 %v97_v4, %v94_v3  ;;  %v624_v12 = vpack.c.bf16 %v131_v6, %v128_v1  ;;  %v100_v15 = vld [vmem:[#allocation7 + $0xa0] sm:$0xff] }
  0x5c   :  { %v135_v9 = vld [vmem:[#allocation7 + $0x1b8] sm:$0xff]  ;;  %v134_v13 = vld [vmem:[#allocation7 + $0x1b0] sm:$0xff]  ;;  %v666_v14 = vpack.c.bf16 %v151_v8, %v148_v7  ;;  %v137_v18 = vld [vmem:[#allocation7 + $0x1c8] sm:$0xff] }
  0x5d   :  { %v103_v16 = vld [vmem:[#allocation7 + $0xb8] sm:$0xff]  ;;  %v626_v17 = vpack.c.bf16 %v138_v10, %v135_v9  ;;  %v154_v19 = vld [vmem:[#allocation7 + $0x250] sm:$0xff]  ;;  %v157_v20 = vld [vmem:[#allocation7 + $0x268] sm:$0xff]  ;;  %v628_v24 = vpack.c.bf16 %v137_v18, %v134_v13 }
  0x5e   :  { %609 = vmatpush1.bf16.msra.mxu0 %v608_v31  ;;  %661 = vmatpush3.bf16.msra.mxu1 %v660_v63  ;;  %v141_v21 = vld [vmem:[#allocation7 + $0x1e8] sm:$0xff]  ;;  %v144_v22 = vld [vmem:[#allocation7 + $0x200] sm:$0xff]  ;;  %v668_v23 = vpack.c.bf16 %v103_v16, %v100_v15  ;;  %v670_v26 = vpack.c.bf16 %v157_v20, %v154_v19  ;;  %v106_v27 = vld [vmem:[#allocation7 + $0xd0] sm:$0xff] }
  0x5f   :  { %611 = vmatprep.subr.bf16.mxu0 %v610_v32  ;;  %663 = vmatprep.subr.bf16.mxu1 %v662_v2  ;;  %v140_v25 = vld [vmem:[#allocation7 + $0x1e0] sm:$0xff]  ;;  %v109_v28 = vld [vmem:[#allocation7 + $0xe8] sm:$0xff]  ;;  %v630_v29 = vpack.c.bf16 %v144_v22, %v141_v21  ;;  %v143_v30 = vld [vmem:[#allocation7 + $0x1f8] sm:$0xff] }
  0x60   :  { %v160_v31 = vld [vmem:[#allocation7 + $0x280] sm:$0xff]  ;;  %v163_v32 = vld [vmem:[#allocation7 + $0x298] sm:$0xff]  ;;  %v150_v34 = vld [vmem:[#allocation7 + $0x230] sm:$0xff]  ;;  %v672_v35 = vpack.c.bf16 %v109_v28, %v106_v27  ;;  %v632_v36 = vpack.c.bf16 %v143_v30, %v140_v25 }
  0x61   :  { %v147_v33 = vld [vmem:[#allocation7 + $0x218] sm:$0xff]  ;;  %v112_v39 = vld [vmem:[#allocation7 + $0x100] sm:$0xff]  ;;  %v149_v43 = vld [vmem:[#allocation7 + $0x228] sm:$0xff] }
  0x62   :  { %613 = vmatpush1.bf16.msra.mxu0 %v612_v37  ;;  %665 = vmatpush3.bf16.msra.mxu1 %v664_v11  ;;  %v146_v37 = vld [vmem:[#allocation7 + $0x210] sm:$0xff]  ;;  %v115_v40 = vld [vmem:[#allocation7 + $0x118] sm:$0xff]  ;;  %v634_v42 = vpack.c.bf16 %v150_v34, %v147_v33  ;;  %v169_v45 = vld [vmem:[#allocation7 + $0x2c8] sm:$0xff] }
  0x63   :  { %615 = vmatprep.subr.bf16.mxu0 %v614_v38  ;;  %667 = vmatprep.subr.bf16.mxu1 %v666_v14  ;;  %v674_v38 = vpack.c.bf16 %v163_v32, %v160_v31  ;;  %v166_v44 = vld [vmem:[#allocation7 + $0x2b0] sm:$0xff]  ;;  %v153_v46 = vld [vmem:[#allocation7 + $0x248] sm:$0xff]  ;;  %v156_v47 = vld [vmem:[#allocation7 + $0x260] sm:$0xff]  ;;  %v676_v48 = vpack.c.bf16 %v115_v40, %v112_v39  ;;  %v636_v49 = vpack.c.bf16 %v149_v43, %v146_v37 }
  0x64   :  { %v678_v51 = vpack.c.bf16 %v169_v45, %v166_v44  ;;  %v118_v52 = vld [vmem:[#allocation7 + $0x130] sm:$0xff]  ;;  %v121_v53 = vld [vmem:[#allocation7 + $0x148] sm:$0xff]  ;;  %v638_v54 = vpack.c.bf16 %v156_v47, %v153_v46  ;;  %v155_v55 = vld [vmem:[#allocation7 + $0x258] sm:$0xff]  ;;  %v178_v46 = vlaneseq }
  0x65   :  { %v175_v57 = vld [vmem:[#allocation7 + $0x2f8] sm:$0xff]  ;;  %v162_v59 = vld [vmem:[#allocation7 + $0x290] sm:$0xff]  ;;  %v680_v60 = vpack.c.bf16 %v121_v53, %v118_v52  ;;  %v161_v1 = vld [vmem:[#allocation7 + $0x288] sm:$0xff] }
  0x66   :  { %617 = vmatpush1.bf16.msra.mxu0 %v616_v50  ;;  %669 = vmatpush3.bf16.msra.mxu1 %v668_v23  ;;  %v152_v50 = vld [vmem:[#allocation7 + $0x240] sm:$0xff]  ;;  %v159_v58 = vld [vmem:[#allocation7 + $0x278] sm:$0xff]  ;;  %v165_v2 = vld [vmem:[#allocation7 + $0x2a8] sm:$0xff]  ;;  %v179_v47 = vshrl.u32 %v178_v46, 7 }
  0x67   :  { %619 = vmatprep.subr.bf16.mxu0 %v618_v56  ;;  %671 = vmatprep.subr.bf16.mxu1 %v670_v26  ;;  %v172_v56 = vld [vmem:[#allocation7 + $0x2e0] sm:$0xff]  ;;  %v640_v61 = vpack.c.bf16 %v155_v55, %v152_v50  ;;  %v642_v63 = vpack.c.bf16 %v162_v59, %v159_v58  ;;  %v167_v7 = vld [vmem:[#allocation7 + $0x2b8] sm:$0xff]  ;;  %v174_v9 = vld [vmem:[#allocation7 + $0x2f0] sm:$0xff] }
  0x68   :  { %v682_v62 = vpack.c.bf16 %v175_v57, %v172_v56  ;;  %v168_v3 = vld [vmem:[#allocation7 + $0x2c0] sm:$0xff]  ;;  %v171_v8 = vld [vmem:[#allocation7 + $0x2d8] sm:$0xff]  ;;  %v173_v13 = vld [vmem:[#allocation7 + $0x2e8] sm:$0xff] }
  0x69   :  { %v164_v6 = vld [vmem:[#allocation7 + $0x2a0] sm:$0xff]  ;;  %v650_v11 = vpack.c.bf16 %v174_v9, %v171_v8  ;;  %v78_v15 = vld [vmem:[#allocation5] sm:$0xff]  ;;  %v972_v16 = vld [vmem:[#allocation2 + $0x8] sm:$0xff]  ;;  %v184_v9 = vsub.s32 1, %v179_v47 }
  0x6a   :  { %621 = vmatpush1.bf16.msra.mxu0 %v620_v0  ;;  %673 = vmatpush3.bf16.msra.mxu1 %v672_v35  ;;  %v158_v0 = vld [vmem:[#allocation7 + $0x270] sm:$0xff]  ;;  %v648_v10 = vpack.c.bf16 %v167_v7, %v164_v6  ;;  %v124_v18 = vld [vmem:[#allocation7 + $0x160] sm:$0xff]  ;;  %v127_v19 = vld [vmem:[#allocation7 + $0x178] sm:$0xff] }
  0x6b   :  { %623 = vmatprep.subr.bf16.mxu0 %v622_v5  ;;  %675 = vmatprep.subr.bf16.mxu1 %v674_v38  ;;  %v644_v4 = vpack.c.bf16 %v161_v1, %v158_v0  ;;  %v646_v5 = vpack.c.bf16 %v168_v3, %v165_v2  ;;  %v684_v20 = vpack.c.bf16 %v127_v19, %v124_v18  ;;  %v371_v21 = vld [vmem:[#allocation8] sm:$0xff]  ;;  %v372_v22 = vld [vmem:[#allocation8 + $0x8] sm:$0xff]  ;;  %v374_v25 = vld [vmem:[#allocation8 + $0x18] sm:$0xff]  ;;  %v188_v18 = vsub.s32 2, %v179_v47 }
  0x6c   :  { %v686_v23 = vpack.c.bf16 %v372_v22, %v371_v21  ;;  %v375_v27 = vld [vmem:[#allocation8 + $0x20] sm:$0xff]  ;;  %v376_v28 = vld [vmem:[#allocation8 + $0x28] sm:$0xff]  ;;  %v377_v30 = vld [vmem:[#allocation8 + $0x30] sm:$0xff] }
  0x6d   :  { %v378_v31 = vld [vmem:[#allocation8 + $0x38] sm:$0xff]  ;;  %v379_v33 = vld [vmem:[#allocation8 + $0x40] sm:$0xff]  ;;  %v380_v34 = vld [vmem:[#allocation8 + $0x48] sm:$0xff] }
  0x6e   :  { %625 = vmatpush1.bf16.msra.mxu0 %v624_v12  ;;  %677 = vmatpush3.bf16.msra.mxu1 %v676_v48  ;;  %v170_v12 = vld [vmem:[#allocation7 + $0x2d0] sm:$0xff]  ;;  %v698_v32 = vpack.c.bf16 %v378_v31, %v377_v30  ;;  %v702_v35 = vpack.c.bf16 %v380_v34, %v379_v33  ;;  %v382_v37 = vld [vmem:[#allocation8 + $0x58] sm:$0xff]  ;;  %v383_v39 = vld [vmem:[#allocation8 + $0x60] sm:$0xff]  ;;  %v180_v48 = vsub.s32 0, %v179_v47 }
  0x6f   :  { %627 = vmatprep.subr.bf16.mxu0 %v626_v17  ;;  %679 = vmatprep.subr.bf16.mxu1 %v678_v51  ;;  %v652_v14 = vpack.c.bf16 %v173_v13, %v170_v12  ;;  %v79_v17 = vld [vmem:[#allocation5 + $0x8] sm:$0xff]  ;;  %v384_v40 = vld [vmem:[#allocation8 + $0x68] sm:$0xff] }
  0x70   :  { %v710_v43 = vpack.c.bf16 %v384_v40, %v383_v39  ;;  %v386_v44 = vld [vmem:[#allocation8 + $0x78] sm:$0xff] }
  0x72   :  { %629 = vmatpush1.bf16.msra.mxu0 %v628_v24  ;;  %681 = vmatpush3.bf16.msra.mxu1 %v680_v60  ;;  %v373_v24 = vld [vmem:[#allocation8 + $0x10] sm:$0xff] }
  0x73   :  { %631 = vmatprep.subr.bf16.mxu0 %v630_v29  ;;  %683 = vmatprep.subr.bf16.mxu1 %v682_v62  ;;  %v690_v26 = vpack.c.bf16 %v374_v25, %v373_v24  ;;  %v694_v29 = vpack.c.bf16 %v376_v28, %v375_v27 }
  0x76   :  { %633 = vmatpush1.bf16.msra.mxu0 %v632_v36  ;;  %685 = vmatpush3.bf16.msra.mxu1 %v684_v20  ;;  %v381_v36 = vld [vmem:[#allocation8 + $0x50] sm:$0xff] }
  0x77   :  { %635 = vmatprep.subr.bf16.mxu0 %v634_v42  ;;  %687 = vmatprep.subr.bf16.mxu1 %v686_v23  ;;  %v706_v38 = vpack.c.bf16 %v382_v37, %v381_v36  ;;  %v385_v42 = vld [vmem:[#allocation8 + $0x70] sm:$0xff] }
  0x78   :  { %v714_v45 = vpack.c.bf16 %v386_v44, %v385_v42 }
  0x79   :  { %335 = vmatmul.mubr.f32.vlgmr.msra.gmra.mrb[0].mxu1 %v78_v15 }
  0x7a   :  { %637 = vmatpush1.bf16.msra.mxu0 %v636_v49  ;;  %689 = vmatpush3.bf16.msra.mxu1 %v686_v23  ;;  %v176_v49 = vld [vmem:[%s1002_s4] sm:$0x7]  ;;  %s873_s4 = smov [#allocation10]  }
  0x7b   :  { %639 = vmatprep.subr.bf16.mxu0 %v638_v54  ;;  %339 = vmatprep.mubr.f32.mxu1 %v972_v16  ;;  %v181_v50 = vrot.slane %v176_v49, %v180_v48  ;;  %v189_v21 = vrot.slane %v176_v49, %v188_v18  ;;  %s481_s19 = sshll.u32 %s873_s4, 4  ;;  %s482_s19 = int_to_ptr.vmem [resolvable:$true] %s481_s19 }
  0x7c   :  { %691 = vmatprep.subr.bf16.mxu1 %v690_v26  ;;  %s835_s20 = scalar_lea.vmem %s482_s19, 256  ;;  %p840_p5 = scmp.lt.s32.totalorder %s482_s19, %s482_s19 }
  0x7d   :  { %340 = vmatmul.mubr.f32.gmra.mrb[2].mxu1 %v79_v17  ;;  %p836_p4 = scmp.ne.s32.totalorder %s482_s19, %s835_s20  ;;  %p841_p6 = scmp.lt.s32.totalorder %s835_s20, %s835_s20 }
  0x7e   :  { %641 = vmatpush1.bf16.msra.mxu0 %v640_v61  ;;  %693 = vmatpush3.bf16.msra.mxu1 %v690_v26 }
  0x7f   :  { %643 = vmatprep.subr.bf16.mxu0 %v642_v63  ;;  %695 = vmatprep.subr.bf16.mxu1 %v694_v29  ;;  %p842_p7 = por %p841_p6, %p840_p5 }
  0x81   :  { %p843_p8 = pnand %p842_p7, %p836_p4 }
  0x82   :  { %645 = vmatpush1.bf16.msra.mxu0 %v644_v4  ;;  %697 = vmatpush3.bf16.msra.mxu1 %v694_v29 }
  0x83   :  { %647 = vmatprep.subr.bf16.mxu0 %v646_v5  ;;  %699 = vmatprep.subr.bf16.mxu1 %v698_v32 }
  0x86   :  { %649 = vmatpush1.bf16.msra.mxu0 %v648_v10  ;;  %701 = vmatpush3.bf16.msra.mxu1 %v698_v32  ;;  %v185_v10 = vrot.slane %v176_v49, %v184_v9 }
  0x87   :  { %651 = vmatprep.subr.bf16.mxu0 %v650_v11  ;;  %703 = vmatprep.subr.bf16.mxu1 %v702_v35 }
  0x8a   :  { %653 = vmatpush1.bf16.msra.mxu0 %v652_v14  ;;  %705 = vmatpush3.bf16.msra.mxu1 %v702_v35 }
  0x8b   :  { %707 = vmatprep.subr.bf16.mxu1 %v706_v38 }
  0x8d   :  { %258 = vmatmul.mubr.f32.vlgmr.msra.gmra.mrb[0].mxu0 %v78_v15 }
  0x8e   :  { %263 = vmatprep.mubr.f32.mxu0 %v972_v16  ;;  %709 = vmatpush3.bf16.msra.mxu1 %v706_v38 }
  0x8f   :  { %711 = vmatprep.subr.bf16.mxu1 %v710_v43 }
  0x91   :  { %264 = vmatmul.mubr.f32.gmra.mrb[2].mxu0 %v79_v17 }
  0x92   :  { %713 = vmatpush3.bf16.msra.mxu1 %v710_v43 }
  0x93   :  { %715 = vmatprep.subr.bf16.mxu1 %v714_v45 }
  0x96   :  { %717 = vmatpush3.bf16.msra.mxu1 %v714_v45 }
 0x14c   :  { %v531_v3 = vpop.f32.mrb[0].mxu1 }
 0x14d   :  { %v532_v4 = vpop.f32.mrb[1].mxu1 }
 0x14e   :  { %v533_v5 = vadd.f32 %v532_v4, %v531_v3 }
 0x150   :  { %v534_v6 = vpop.f32.mrb[2].mxu1  ;;  %v337_v24 = vadd.f32 %v533_v5, %v189_v21 }
 0x151   :  { %v535_v7 = vpop.f32.mrb[3].mxu1 }
 0x152   :  { %v536_v8 = vadd.f32 %v535_v7, %v534_v6 }
 0x154   :  { %v342_v22 = vadd.f32 %v536_v8, %v189_v21 }
 0x160   :  { %v259_v51 = vpop.f32.mrb[0].mxu0 }
 0x161   :  { %v260_v52 = vadd.f32 %v259_v51, %v181_v50  ;;  %v261_v53 = vpop.f32.mrb[1].mxu0 }
 0x162   :  { %v262_v12 = vadd.f32 %v261_v53, %v185_v10 }
 0x163   :  { %v495_v54 = vmul.f32 -1.442695, %v260_v52 }
 0x164   :  { %v265_v55 = vpop.f32.mrb[2].mxu0  ;;  %v497_v14 = vmul.f32 -1.442695, %v262_v12 }
 0x165   :  { %727 = vpow2.f32 %v495_v54  ;;  %v266_v56 = vadd.f32 %v265_v55, %v181_v50  ;;  %v267_v57 = vpop.f32.mrb[3].mxu0 }
 0x166   :  { %v268_v11 = vadd.f32 %v267_v57, %v185_v10 }
 0x167   :  { %v496_v58 = vmul.f32 -1.442695, %v266_v56 }
 0x168   :  { %v498_v13 = vmul.f32 -1.442695, %v268_v11 }
 0x169   :  { %729 = vpow2.f32 %v496_v58 }
 0x16f   :  { %v728_v59 = vpop.eup %727 }
 0x170   :  { %v351_v60 = vadd.f32 1.0, %v728_v59 }
 0x172   :  { %731 = vrcp.f32 %v351_v60 }
 0x173   :  { %v730_v61 = vpop.eup %729 }
 0x174   :  { %v352_v62 = vadd.f32 1.0, %v730_v61 }
 0x176   :  { %733 = vrcp.f32 %v352_v62 }
 0x177   :  { %735 = vpow2.f32 %v498_v13 }
 0x178   :  { %737 = vpow2.f32 %v497_v14 }
 0x17c   :  { %v732_v63 = vpop.eup %731 }
 0x17d   :  { %v369_v0 = vmul.f32 %v732_v63, %v968_v41 }
 0x17f   :  { %587 = vmatprep.mubr.f32.mxu1 %v369_v0 }
 0x180   :  { %v734_v1 = vpop.eup %733 }
 0x181   :  { %v370_v2 = vmul.f32 %v734_v1, %v972_v16  ;;  %v736_v15 = vpop.eup %735 }
 0x182   :  { %v738_v17 = vpop.eup %737  ;;  %v364_v19 = vadd.f32 1.0, %v736_v15 }
 0x183   :  { %588 = vmatmul.mubr.f32.vlgmr.msra.gmra.mrb[4].mxu1 %v370_v2  ;;  %v363_v20 = vadd.f32 1.0, %v738_v17 }
 0x184   :  { %739 = vrcp.f32 %v364_v19 }
 0x185   :  { %741 = vrcp.f32 %v363_v20 }
 0x18e   :  { %v740_v28 = vpop.eup %739 }
 0x18f   :  { %v742_v29 = vpop.eup %741  ;;  %v467_v30 = vsub.f32 1.0, %v740_v28 }
 0x190   :  { %v466_v31 = vsub.f32 1.0, %v742_v29 }
 0x191   :  { %v469_v34 = vmul.f32 %v467_v30, %v972_v16 }
 0x192   :  { %v468_v36 = vmul.f32 %v466_v31, %v968_v41 }
 0x256   :  { %v589_v23 = vpop.f32.mrb[4].mxu1 }
 0x257   :  { %v463_v25 = vadd.f32 %v589_v23, %v342_v22  ;;  %v453_v26 = vpop.f32.mrb[5].mxu1 }
 0x258   :  { %v462_v27 = vadd.f32 %v453_v26, %v337_v24 }
 0x259   :  { %743 = vtanh.f32 %v463_v25 }
 0x25a   :  { %745 = vtanh.f32 %v462_v27 }
 0x263   :  { %v744_v32 = vpop.eup %743 }
 0x264   :  { %v746_v33 = vpop.eup %745  ;;  %v471_v35 = vmul.f32 %v744_v32, %v740_v28 }
 0x265   :  { %v470_v37 = vmul.f32 %v746_v33, %v742_v29 }
 0x266   :  { %v473_v38 = vadd.f32 %v471_v35, %v469_v34 }
 0x267   :  { %v472_v39 = vadd.f32 %v470_v37, %v468_v36 }
 0x268   :  { %475 = vst [vmem:[#allocation10 + $0x8] sm:$0xff] %v473_v38 }
 0x269   :  { %474 = vst [vmem:[#allocation10] sm:$0xff] %v472_v39 }
 0x26a   :  { %846 = shalt.err (!%p843_p8)
}
 0x26b   :  { %s847_s24 = scalar_lea.hbm %s1003_s5, 256 }
 0x26c   :  { %p848_p9 = scmp.ne.s32.totalorder %s1003_s5, %s847_s24  ;;  %p851_p10 = scmp.lt.u32.totalorder %s847_s24, %s1003_s5 }
 0x26e   :  { %p853_p11 = pnand %p851_p10, %p848_p9 }
 0x270   :  { %856 = shalt.err (!%p853_p11)
}
 0x271   :  { %487 = dma.vmem_to_hbm [thread:$0]  %s482_s19, 256, %s1003_s5, [#allocation4], %s867_s30, %s867_s30, %s868_s6  }
 0x272   :  { %863 = dma.done.wait [#allocation4], 256  }
 0x273   :  { %864 = vsyncadd [#allocation4], 4294967040 }
 0x274   :  { %491 = vsyncpa [#allocation3], 1 }
 0x275   :  { %492 = vsyncpa [#allocation6], 1 }
 0x276   :  { %493 = vsyncpa [#allocation9], 1 }
 0x277   :  { %494 = vsyncpa [#allocation4], 1 }

</bundles_post_ra>
